<compile_context>
chip_gen: v6e
topology: v6e:2x2x1
jax: 0.10.0
libtpu: 0.0.40
codegen_flags: <defaults>
</compile_context>

<pallas_src>
import math
from functools import partial

import jax
import jax.numpy as jnp
from jax import lax
from jax.experimental import pallas as pl
from jax.experimental.pallas import tpu as pltpu

OMEGA = 10.0
EPSILON = 2.0
INV_EPSILON = 1.0 / EPSILON
# C = omega - omega * log(1 + omega/epsilon)
C_CONST = OMEGA - OMEGA * math.log(1.0 + OMEGA / EPSILON)

_LANES = 128
_SUBLANES = 8
_TARGET_BLOCK_BYTES = 2 * 1024 * 1024    # per-input, per-pipeline-buffer block
_VMEM_LIMIT_BYTES = 32 * 1024 * 1024     # explicit scoped-VMEM request (all gens)


def _wing_elementwise(pred_f32, tgt_f32):
    """Elementwise wing loss in f32 (shared by kernel, tail path and reference)."""
    delta = jnp.abs(tgt_f32 - pred_f32)
    return jnp.where(
        delta < OMEGA,
        OMEGA * jnp.log1p(delta * INV_EPSILON),   # VPU mul + EUP log
        delta - C_CONST,
    )


def _wing_loss_partial_kernel(pred_ref, tgt_ref, out_ref, *,
                              valid_rows, tile_rows, need_mask):
    loss = _wing_elementwise(pred_ref[...].astype(jnp.float32),
                             tgt_ref[...].astype(jnp.float32))

    groups = tile_rows // _SUBLANES

    def write_partial(x):
        # Sublane-group (vreg-wise) reduction -> full (8, 128) tile, unmasked store.
        out_ref[...] = jnp.sum(
            x.reshape(groups, _SUBLANES, _LANES), axis=0)[None]

    if not need_mask:
        # No block overhangs the real row count: always take the unmasked path.
        write_partial(loss)
    else:
        i = pl.program_id(0)
        last = pl.num_programs(0) - 1

        @pl.when(i != last)
        def _():
            write_partial(loss)

        @pl.when(i == last)
        def _():
            # Only the last block overhangs `valid_rows`; its out-of-range rows
            # hold unspecified VMEM data (possibly NaN/Inf after the loss math),
            # so zero them with a select BEFORE the reduction.
            row = i * tile_rows + lax.broadcasted_iota(
                jnp.int32, (tile_rows, 1), 0)
            write_partial(jnp.where(row < valid_rows, loss, 0.0))


def wing_loss(pred, target, *, block_rows=None):
    """Pallas implementation of WingLoss.forward(pred, target) -> scalar f32."""
    assert pred.shape == target.shape, "pred/target shape mismatch"
    n_elem = pred.size
    assert n_elem > 0

    flat_p = pred.reshape(-1)
    flat_t = target.reshape(-1)

    rem = n_elem % _LANES
    aligned = n_elem - rem
    rows = aligned // _LANES

    total = jnp.float32(0.0)

    if rows < _SUBLANES:
        # Tiny input (< ~1K elements): not worth a kernel launch.
        total = jnp.sum(_wing_elementwise(flat_p.astype(jnp.float32),
                                          flat_t.astype(jnp.float32)))
        return (total / jnp.float32(n_elem)).astype(jnp.float32)

    if rem:
        # Sub-128 ragged tail handled in plain JAX (tiny) -- avoids the old
        # jnp.pad path that materialized full-size copies of both inputs.
        total = total + jnp.sum(
            _wing_elementwise(flat_p[aligned:].astype(jnp.float32),
                              flat_t[aligned:].astype(jnp.float32)))
        flat_p = flat_p[:aligned]
        flat_t = flat_t[:aligned]

    # Lane-dense 2-D view; when n_elem % 128 == 0 this is a pure bitcast.
    p2d = flat_p.reshape(rows, _LANES)
    t2d = flat_t.reshape(rows, _LANES)

    itemsize = jnp.dtype(pred.dtype).itemsize
    if block_rows is None:
        # 2 MiB per input per pipeline buffer: 4096 rows f32 / 8192 rows bf16.
        block_rows = max(_SUBLANES, _TARGET_BLOCK_BYTES // (_LANES * itemsize))
    tile_rows = min(block_rows, rows)
    tile_rows = max(_SUBLANES, (tile_rows // _SUBLANES) * _SUBLANES)

    grid_n = pl.cdiv(rows, tile_rows)
    need_mask = (rows % tile_rows) != 0

    kernel = partial(_wing_loss_partial_kernel,
                     valid_rows=rows, tile_rows=tile_rows, need_mask=need_mask)

    n_proc = rows * _LANES
    cost = pl.CostEstimate(
        flops=6 * n_proc,
        transcendentals=n_proc,
        bytes_accessed=2 * n_proc * itemsize + grid_n * _SUBLANES * _LANES * 4,
    )

    partials = pl.pallas_call(
        kernel,
        out_shape=jax.ShapeDtypeStruct((grid_n, _SUBLANES, _LANES), jnp.float32),
        grid_spec=pltpu.PrefetchScalarGridSpec(
            num_scalar_prefetch=0,
            grid=(grid_n,),
            in_specs=[
                pl.BlockSpec((tile_rows, _LANES), lambda i: (i, 0)),
                pl.BlockSpec((tile_rows, _LANES), lambda i: (i, 0)),
            ],
            out_specs=pl.BlockSpec((1, _SUBLANES, _LANES), lambda i: (i, 0, 0)),
        ),
        compiler_params=pltpu.CompilerParams(
            dimension_semantics=("parallel",),
            vmem_limit_bytes=_VMEM_LIMIT_BYTES,
        ),
        cost_estimate=cost,
    )(p2d, t2d)

    total = total + jnp.sum(partials)
    return (total / jnp.float32(n_elem)).astype(jnp.float32)


def _wing_loss_ref(pred, target):
    """Pure-JAX reference mirroring the PyTorch module."""
    loss = _wing_elementwise(pred.astype(jnp.float32).reshape(-1),
                             target.astype(jnp.float32).reshape(-1))
    return jnp.mean(loss)


if __name__ == "__main__":
    key = jax.random.PRNGKey(0)
    k1, k2, k3, k4 = jax.random.split(key, 4)

    # Primary: landmark-regression style predictions [B, C, H, W] (2048 elems).
    shape = (2, 4, 16, 16)
    # Scale so both branches (delta < omega and delta >= omega) are exercised.
    pred = jax.random.normal(k1, shape, dtype=jnp.float32) * 8.0
    target = jax.random.normal(k2, shape, dtype=jnp.float32) * 8.0
    out = jax.block_until_ready(wing_loss(pred, target))
    ref = _wing_loss_ref(pred, target)
    assert jnp.allclose(out, ref, rtol=1e-5, atol=1e-5), (out, ref)

    # Ragged case: n % 128 != 0 (tail path) + multi-block grid with a masked
    # last block (block_rows=8 forces several grid steps on a small array).
    shape2 = (3, 17, 43)   # 2193 elements -> 17 aligned rows + 17-element tail
    pred2 = jax.random.normal(k3, shape2, dtype=jnp.float32) * 8.0
    target2 = jax.random.normal(k4, shape2, dtype=jnp.float32) * 8.0
    out2 = jax.block_until_ready(wing_loss(pred2, target2, block_rows=8))
    ref2 = _wing_loss_ref(pred2, target2)
    assert jnp.allclose(out2, ref2, rtol=1e-5, atol=1e-5), (out2, ref2)

    print("KERNEL_OK")
</pallas_src>

<mosaic_0001>
module attributes {stable_mosaic.version = 11 : i64} {
  func.func @_wing_loss_partial_kernel(%arg0: i32, %arg1: memref<16x128xf32, #tpu.memory_space<vmem>>, %arg2: memref<16x128xf32, #tpu.memory_space<vmem>>, %arg3: memref<1x8x128xf32, #tpu.memory_space<vmem>>) attributes {dimension_semantics = [#tpu.dimension_semantics<parallel>], iteration_bounds = array<i64: 1>, scalar_prefetch = 0 : i64, scratch_operands = 0 : i64, tpu.core_type = #tpu.core_type<tc>, window_params = [{transform_indices = @transform_0, window_bounds = array<i64: 16, 128>}, {transform_indices = @transform_1, window_bounds = array<i64: 16, 128>}, {transform_indices = @transform_2, window_bounds = array<i64: 1, 8, 128>}]} {
    %c0 = arith.constant 0 : index
    %c0_0 = arith.constant 0 : index
    %0 = vector.load %arg1[%c0, %c0_0] : memref<16x128xf32, #tpu.memory_space<vmem>>, vector<16x128xf32>
    %c0_1 = arith.constant 0 : index
    %c0_2 = arith.constant 0 : index
    %1 = vector.load %arg2[%c0_1, %c0_2] : memref<16x128xf32, #tpu.memory_space<vmem>>, vector<16x128xf32>
    %2 = arith.subf %1, %0 : vector<16x128xf32>
    %3 = math.absf %2 : vector<16x128xf32>
    %cst = arith.constant 1.000000e+01 : f32
    %4 = vector.broadcast %cst : f32 to vector<16x128xf32>
    %5 = arith.cmpf olt, %3, %4 : vector<16x128xf32>
    %cst_3 = arith.constant 5.000000e-01 : f32
    %6 = vector.broadcast %cst_3 : f32 to vector<16x128xf32>
    %7 = arith.mulf %3, %6 : vector<16x128xf32>
    %8 = math.log1p %7 : vector<16x128xf32>
    %cst_4 = arith.constant 1.000000e+01 : f32
    %9 = vector.broadcast %cst_4 : f32 to vector<16x128xf32>
    %10 = arith.mulf %9, %8 : vector<16x128xf32>
    %cst_5 = arith.constant -7.9175949 : f32
    %11 = vector.broadcast %cst_5 : f32 to vector<16x128xf32>
    %12 = arith.subf %3, %11 : vector<16x128xf32>
    %13 = arith.select %5, %10, %12 : vector<16x128xi1>, vector<16x128xf32>
    %14 = vector.shape_cast %13 : vector<16x128xf32> to vector<2x8x128xf32>
    %cst_6 = arith.constant dense<0.000000e+00> : vector<8x128xf32>
    %15 = vector.multi_reduction <add>, %14, %cst_6 [0] : vector<2x8x128xf32> to vector<8x128xf32>
    %16 = vector.shape_cast %15 : vector<8x128xf32> to vector<1x8x128xf32>
    %c0_7 = arith.constant 0 : index
    %c0_8 = arith.constant 0 : index
    %c0_9 = arith.constant 0 : index
    %17 = vector.load %arg3[%c0_7, %c0_8, %c0_9] : memref<1x8x128xf32, #tpu.memory_space<vmem>>, vector<1x8x128xf32>
    tpu.vector_store %arg3[%c0_7, %c0_8, %c0_9], %16 {strides = array<i32>} : memref<1x8x128xf32, #tpu.memory_space<vmem>>, vector<1x8x128xf32>,
    return
  }
  func.func @transform_0(%arg0: i32) -> (i32, i32) {
    %c0_i32 = arith.constant 0 : i32
    %c0_i32_0 = arith.constant 0 : i32
    return %arg0, %c0_i32 : i32, i32
  }
  func.func @transform_1(%arg0: i32) -> (i32, i32) {
    %c0_i32 = arith.constant 0 : i32
    %c0_i32_0 = arith.constant 0 : i32
    return %arg0, %c0_i32 : i32, i32
  }
  func.func @transform_2(%arg0: i32) -> (i32, i32, i32) {
    %c0_i32 = arith.constant 0 : i32
    %c0_i32_0 = arith.constant 0 : i32
    %c0_i32_1 = arith.constant 0 : i32
    return %arg0, %c0_i32, %c0_i32_0 : i32, i32, i32
  }
}

</mosaic_0001>

<bundles_post_ra>
// kernel: tpu_custom_call.1
= control target key start
LH: loop header
LB: loop body
LE: loop exit
PB: predicated region body
PF: predicated region fallthrough
CT: control target
= control target key end

     0   :  { %7 = vsyncpa [#allocation3], 0  ;;  %s200_s0 = inlined_call_operand.hbm [shape: f32[16,128], index: 0, kind: input, shape index: {}]   ;;  %s201_s1 = inlined_call_operand.hbm [shape: f32[16,128], index: 1, kind: input, shape index: {}]   ;;  %s202_s2 = inlined_call_operand.hbm [shape: f32[1,8,128], index: 2, kind: output, shape index: {}]  }
   0x1   :  { %8 = vsyncpa [#allocation6], 0 }
   0x2   :  { %9 = vsyncpa [#allocation4], 0  ;;  %s171_s9 = smov [#allocation2]  }
   0x3   :  { %s15_s10 = sshll.u32 %s171_s9, 4  ;;  %s16_s10 = int_to_ptr.vmem [resolvable:$true] %s15_s10 }
   0x4   :  { %s113_s11 = scalar_lea.vmem %s16_s10, 256  ;;  %p118_p1 = scmp.lt.s32.totalorder %s16_s10, %s16_s10 }
   0x5   :  { %p114_p0 = scmp.ne.s32.totalorder %s16_s10, %s113_s11  ;;  %p119_p2 = scmp.lt.s32.totalorder %s113_s11, %s113_s11 }
   0x7   :  { %p120_p3 = por %p119_p2, %p118_p1 }
   0x9   :  { %p121_p4 = pnand %p120_p3, %p114_p0 }
   0xb   :  { %124 = shalt.err (!%p121_p4)
}
   0xc   :  { %s172_s12 = smov 128   ;;  %s173_s13 = smov 8  }
   0xd   :  { %21 = dma.hbm_to_vmem [thread:$0]  %s200_s0, 256, %s16_s10, [#allocation3], %s172_s12, %s172_s12, %s173_s13  }
   0xe   :  { %s174_s16 = smov [#allocation5]  }
   0xf   :  { %s27_s17 = sshll.u32 %s174_s16, 4  ;;  %s28_s17 = int_to_ptr.vmem [resolvable:$true] %s27_s17 }
  0x10   :  { %s133_s18 = scalar_lea.vmem %s28_s17, 256  ;;  %p138_p6 = scmp.lt.s32.totalorder %s28_s17, %s28_s17 }
  0x11   :  { %p134_p5 = scmp.ne.s32.totalorder %s28_s17, %s133_s18  ;;  %p139_p7 = scmp.lt.s32.totalorder %s133_s18, %s133_s18 }
  0x13   :  { %p140_p8 = por %p139_p7, %p138_p6 }
  0x15   :  { %p141_p9 = pnand %p140_p8, %p134_p5 }
  0x17   :  { %144 = shalt.err (!%p141_p9)
}
  0x18   :  { %33 = dma.hbm_to_vmem [thread:$0]  %s201_s1, 256, %s28_s17, [#allocation6], %s172_s12, %s172_s12, %s173_s13  }
  0x19   :  { %165 = dma.done.wait [#allocation3], 256  }
  0x1a   :  { %166 = vsyncadd [#allocation3], 4294967040 }
  0x1b   :  { %167 = dma.done.wait [#allocation6], 256  }
  0x1c   :  { %168 = vsyncadd [#allocation6], 4294967040  ;;  %v40_v0 = vld [vmem:[#allocation2] sm:$0xff]  ;;  %v41_v1 = vld [vmem:[#allocation2 + $0x8] sm:$0xff]  ;;  %s175_s0 = smov [#allocation7]  }
  0x1d   :  { %v42_v2 = vld [vmem:[#allocation5] sm:$0xff]  ;;  %v43_v3 = vld [vmem:[#allocation5 + $0x8] sm:$0xff]  ;;  %s84_s1 = sshll.u32 %s175_s0, 4  ;;  %s85_s1 = int_to_ptr.vmem [resolvable:$true] %s84_s1 }
  0x1e   :  { %v44_v4 = vsub.f32 %v42_v2, %v40_v0  ;;  %v45_v5 = vsub.f32 %v43_v3, %v41_v1  ;;  %s145_s21 = scalar_lea.vmem %s85_s1, 128  ;;  %p150_p11 = scmp.lt.s32.totalorder %s85_s1, %s85_s1 }
  0x1f   :  { %p146_p10 = scmp.ne.s32.totalorder %s85_s1, %s145_s21  ;;  %p151_p12 = scmp.lt.s32.totalorder %s145_s21, %s145_s21 }
  0x20   :  { %v46_v6 = vand.u32 2147483647, %v44_v4  ;;  %v47_v7 = vand.u32 2147483647, %v45_v5 }
  0x21   :  { %p152_p13 = por %p151_p12, %p150_p11 }
  0x22   :  { %v50_v8 = vmul.f32 0.5, %v46_v6  ;;  %v51_v9 = vmul.f32 0.5, %v47_v7  ;;  %v94_v24 = vadd.f32 7.917595, %v46_v6  ;;  %vm48_vm2 = vcmp.lt.f32.partialorder %v46_v6, 10.0 }
  0x23   :  { %v95_v26 = vadd.f32 7.917595, %v47_v7  ;;  %vm49_vm3 = vcmp.lt.f32.partialorder %v47_v7, 10.0  ;;  %p153_p0 = pnand %p152_p13, %p146_p10 }
  0x24   :  { %v52_v10 = vadd.f32 1.0, %v50_v8  ;;  %v61_v11 = vadd.f32 1.0, %v51_v9  ;;  %v55_v12 = vmul.f32 -0.5, %v50_v8  ;;  %v64_v13 = vmul.f32 -0.5, %v51_v9 }
  0x25   :  { %v58_v15 = vand.u32 2147483647, %v50_v8  ;;  %v67_v17 = vand.u32 2147483647, %v51_v9 }
  0x26   :  { %101 = vlog2.f32 %v52_v10  ;;  %v56_v14 = vadd.f32 1.0, %v55_v12  ;;  %v65_v16 = vadd.f32 1.0, %v64_v13 }
  0x27   :  { %103 = vlog2.f32 %v61_v11  ;;  %vm59_vm0 = vcmp.lt.f32.partialorder %v58_v15, 0.0004427343  ;;  %vm68_vm1 = vcmp.lt.f32.partialorder %v67_v17, 0.0004427343 }
  0x28   :  { %v57_v18 = vmul.f32 %v56_v14, %v50_v8  ;;  %v66_v20 = vmul.f32 %v65_v16, %v51_v9 }
  0x33   :  { %v102_v19 = vpop.eup %101 }
  0x34   :  { %v104_v21 = vpop.eup %103  ;;  %v54_v22 = vmul.f32 0.6931472, %v102_v19 }
  0x35   :  { %v63_v23 = vmul.f32 0.6931472, %v104_v21 }
  0x36   :  { %v60_v25 = vsel %vm59_vm0, %v57_v18, %v54_v22 }
  0x37   :  { %v69_v27 = vsel %vm68_vm1, %v66_v20, %v63_v23  ;;  %v70_v28 = vmul.f32 10.0, %v60_v25 }
  0x38   :  { %v71_v29 = vmul.f32 10.0, %v69_v27 }
  0x39   :  { %v74_v30 = vsel %vm48_vm2, %v70_v28, %v94_v24 }
  0x3a   :  { %v75_v31 = vsel %vm49_vm3, %v71_v29, %v95_v26 }
  0x3b   :  { %v76_v32 = vadd.f32 %v75_v31, %v74_v30 }
  0x3d   :  { %77 = vst [vmem:[#allocation7] sm:$0xff] %v76_v32 }
  0x3e   :  { %156 = shalt.err (!%p153_p0)
}
  0x3f   :  { %87 = dma.vmem_to_hbm [thread:$0]  %s85_s1, 128, %s202_s2, [#allocation4]  }
  0x40   :  { %169 = dma.done.wait [#allocation4], 128  }
  0x41   :  { %170 = vsyncadd [#allocation4], 4294967168 }
  0x42   :  { %91 = vsyncpa [#allocation3], 1 }
  0x43   :  { %92 = vsyncpa [#allocation6], 1 }
  0x44   :  { %93 = vsyncpa [#allocation4], 1 }

</bundles_post_ra>
